<compile_context>
chip_gen: v5e
topology: v5e:2x2
jax: 0.10.0
libtpu: 0.0.40
codegen_flags: <defaults>
</compile_context>

<pallas_src>
import math
import jax
import jax.numpy as jnp
from jax.experimental import pallas as pl
from jax.experimental.pallas import tpu as pltpu

# ---- module hyper-parameters (match KANLinear.__init__ defaults) -----------
IN_FEATURES = 16
OUT_FEATURES = 32
GRID_SIZE = 5
SPLINE_ORDER = 3
GRID_RANGE = (-1.0, 1.0)
NUM_COEFF = GRID_SIZE + SPLINE_ORDER                  # 8
NUM_KNOTS = GRID_SIZE + 2 * SPLINE_ORDER + 1          # 12

SLAB = 128                                            # lanes per inner slab


def _round_up(x, m):
    return ((x + m - 1) // m) * m


def _default_spline_dtype():
    """bf16 basis recursion on chips with a bf16 VPU (v6e/v7x), else f32."""
    try:
        kind = jax.devices()[0].device_kind.lower()
    except Exception:
        return jnp.float32
    if any(tag in kind for tag in ("v6", "v7", "tpu7")):
        return jnp.bfloat16
    return jnp.float32


def kan_linear_kernel(xT_ref, grid_ref, recips_ref, base_w_ref, spline_w_ref,
                      oT_ref):
    """Fused KANLinear forward on one row-tile (batch on lanes).

    xT_ref:       (IN, TILE_N) f32            transposed input tile
    grid_ref:     (NUM_KNOTS, IN, SLAB) cdt   knots, pre-broadcast across lanes
    recips_ref:   (SO, NUM_KNOTS-1, IN, SLAB) cdt
                  level-k table r_j = 1/(g[j+k]-g[j]), pre-broadcast
    base_w_ref:   (OUT, IN) f32               base_weight
    spline_w_ref: (OUT, NUM_COEFF*IN) cdt     scaled spline weight, flattened
                                              coeff-major / in-minor
    oT_ref:       (OUT, TILE_N) f32           transposed output tile
    """
    cdt = grid_ref.dtype                               # compute dtype (f32/bf16)
    wb = base_w_ref[...]                               # (OUT, IN)
    ws = spline_w_ref[...]                             # (OUT, NUM_COEFF*IN)
    n_slabs = xT_ref.shape[-1] // SLAB                 # static

    # Fully unrolled slab loop (static trip count & static offsets): bounds the
    # Cox-de Boor live set to one 128-lane slab while amortizing grid-step
    # overhead over the whole tile.
    for s in range(n_slabs):
        off = s * SLAB
        xT = xT_ref[:, pl.ds(off, SLAB)]               # (IN, SLAB) f32

        # ---- base path: W_base @ SiLU(x)^T ---------------------------------
        silu = xT * pl.reciprocal(1.0 + jnp.exp(-xT), approx=False)
        acc = jnp.dot(wb, silu, preferred_element_type=jnp.float32)   # (OUT, SLAB)

        # ---- B-spline bases (Cox-de Boor), coeff axis leading --------------
        xe = xT.astype(cdt)[None, :, :]                # (1, IN, SLAB)
        g_lo = grid_ref[:-1]                           # (NUM_KNOTS-1, IN, SLAB)
        g_hi = grid_ref[1:]
        bases = jnp.logical_and(xe >= g_lo, xe < g_hi).astype(cdt)
        for k in range(1, SPLINE_ORDER + 1):
            L = NUM_KNOTS - k                          # current bases length
            # t_j = (x - g_j) / (g_{j+k} - g_j);  right_j = 1 - t_{j+1}
            t = (xe - grid_ref[:L]) * recips_ref[k - 1, :L]   # (L, IN, SLAB)
            bases = t[:-1] * bases[:-1] + (1.0 - t[1:]) * bases[1:]
        # bases: (NUM_COEFF, IN, SLAB); row-major merge of leading dims -> no relayout
        bases_flat = bases.reshape(NUM_COEFF * IN_FEATURES, SLAB)

        # ---- spline path: K = 128 MXU contraction (f32 accumulation) -------
        acc = acc + jnp.dot(ws, bases_flat, preferred_element_type=jnp.float32)

        oT_ref[:, pl.ds(off, SLAB)] = acc.astype(oT_ref.dtype)


def _precompute_recips(grid_f32):
    """Per-level knot-difference reciprocals r_k[j] = 1/(g[j+k]-g[j]).

    Returns (SPLINE_ORDER, NUM_KNOTS-1, IN); level k uses the first
    NUM_KNOTS-k rows.  Guarded against repeated knots (0/0 := 0).
    """
    gT = grid_f32.T                                    # (NUM_KNOTS, IN)
    width = NUM_KNOTS - 1
    levels = []
    for k in range(1, SPLINE_ORDER + 1):
        den = gT[k:] - gT[:-k]                         # (NUM_KNOTS-k, IN)
        r = jnp.where(den == 0, 0.0, 1.0 / jnp.where(den == 0, 1.0, den))
        r = jnp.pad(r, ((0, width - r.shape[0]), (0, 0)))
        levels.append(r)
    return jnp.stack(levels, axis=0)                   # (SO, width, IN)


def kan_linear(x, grid, base_weight, spline_weight, spline_scaler, *,
               tile_n=1024, spline_dtype=None):
    """x: (..., IN_FEATURES) -> (..., OUT_FEATURES)."""
    orig_shape = x.shape
    assert orig_shape[-1] == IN_FEATURES
    if spline_dtype is None:
        spline_dtype = _default_spline_dtype()

    x2 = x.reshape(-1, IN_FEATURES).astype(jnp.float32)
    n = x2.shape[0]

    # ---- row tiling: big tiles, lane-aligned, >= 2 grid steps when possible
    tile_n = max(SLAB, min(_round_up(tile_n, SLAB), 2048))
    n_pad128 = _round_up(max(n, 1), SLAB)
    if n_pad128 >= 2 * SLAB:
        two_step_cap = _round_up((n_pad128 + 1) // 2, SLAB)
    else:
        two_step_cap = SLAB
    tile_n = min(tile_n, max(SLAB, two_step_cap))
    n_pad = _round_up(n, tile_n)

    # single fused pad+transpose XLA op; batch lands on the lane axis
    xT = jnp.pad(x2, ((0, n_pad - n), (0, 0))).T       # (IN, n_pad)

    # ---- parameter / constant plumbing (tiny, plain JAX) --------------------
    grid_f = grid.astype(jnp.float32)
    ge = jnp.broadcast_to(
        grid_f.T[:, :, None].astype(spline_dtype),
        (NUM_KNOTS, IN_FEATURES, SLAB))                # lane-dense knot table
    recips = jnp.broadcast_to(
        _precompute_recips(grid_f)[:, :, :, None].astype(spline_dtype),
        (SPLINE_ORDER, NUM_KNOTS - 1, IN_FEATURES, SLAB))

    scaled = (spline_weight * spline_scaler[:, :, None]).astype(jnp.float32)
    # coeff-major / in-minor flattening to match bases.reshape(K*IN, SLAB)
    spline_w_flat = jnp.transpose(scaled, (0, 2, 1)).reshape(
        OUT_FEATURES, NUM_COEFF * IN_FEATURES).astype(spline_dtype)

    outT = pl.pallas_call(
        kan_linear_kernel,
        out_shape=jax.ShapeDtypeStruct((OUT_FEATURES, n_pad), jnp.float32),
        grid=(n_pad // tile_n,),
        in_specs=[
            pl.BlockSpec((IN_FEATURES, tile_n), lambda i: (0, i)),          # xT
            pl.BlockSpec((NUM_KNOTS, IN_FEATURES, SLAB),
                         lambda i: (0, 0, 0)),                              # knots
            pl.BlockSpec((SPLINE_ORDER, NUM_KNOTS - 1, IN_FEATURES, SLAB),
                         lambda i: (0, 0, 0, 0)),                           # recips
            pl.BlockSpec((OUT_FEATURES, IN_FEATURES), lambda i: (0, 0)),    # W_base
            pl.BlockSpec((OUT_FEATURES, NUM_COEFF * IN_FEATURES),
                         lambda i: (0, 0)),                                 # W_spline
        ],
        out_specs=pl.BlockSpec((OUT_FEATURES, tile_n), lambda i: (0, i)),
        compiler_params=pltpu.CompilerParams(
            dimension_semantics=("parallel",)),
    )(xT, ge, recips, base_weight.astype(jnp.float32), spline_w_flat)

    out = outT[:, :n].T                                # (n, OUT)
    return out.reshape(*orig_shape[:-1], OUT_FEATURES).astype(x.dtype)


# ---- pure-JAX reference (mirrors PyTorch forward exactly) ------------------
def kan_linear_ref(x, grid, base_weight, spline_weight, spline_scaler):
    orig_shape = x.shape
    x2 = x.reshape(-1, IN_FEATURES)
    silu = x2 * jax.nn.sigmoid(x2)
    base_out = jnp.dot(silu, base_weight.T, precision=jax.lax.Precision.HIGHEST)
    xe = x2[:, :, None]
    g = grid[None, :, :]
    bases = jnp.logical_and(xe >= g[:, :, :-1], xe < g[:, :, 1:]).astype(x2.dtype)
    for k in range(1, SPLINE_ORDER + 1):
        left = (xe - g[:, :, : -(k + 1)]) / (g[:, :, k:-1] - g[:, :, : -(k + 1)])
        right = (g[:, :, k + 1:] - xe) / (g[:, :, k + 1:] - g[:, :, 1:-k])
        bases = left * bases[:, :, :-1] + right * bases[:, :, 1:]
    scaled = spline_weight * spline_scaler[:, :, None]
    spline_out = jnp.dot(bases.reshape(x2.shape[0], -1),
                         scaled.reshape(OUT_FEATURES, -1).T,
                         precision=jax.lax.Precision.HIGHEST)
    out = base_out + spline_out
    return out.reshape(*orig_shape[:-1], OUT_FEATURES)


if __name__ == "__main__":
    key = jax.random.PRNGKey(0)
    k_x, k_bw, k_sw, k_ss = jax.random.split(key, 4)

    # grid buffer: (IN, grid_size + 2*spline_order + 1)
    h = (GRID_RANGE[1] - GRID_RANGE[0]) / GRID_SIZE
    knots = jnp.arange(-SPLINE_ORDER, GRID_SIZE + SPLINE_ORDER + 1,
                       dtype=jnp.float32) * h + GRID_RANGE[0]
    grid = jnp.broadcast_to(knots, (IN_FEATURES, NUM_KNOTS))

    # deterministic parameter init (shapes match the module; synthetic values)
    bound = 1.0 / math.sqrt(IN_FEATURES)
    base_weight = jax.random.uniform(
        k_bw, (OUT_FEATURES, IN_FEATURES), jnp.float32, -bound, bound)
    spline_weight = 0.1 * jax.random.normal(
        k_sw, (OUT_FEATURES, IN_FEATURES, NUM_COEFF), jnp.float32)
    spline_scaler = jax.random.uniform(
        k_ss, (OUT_FEATURES, IN_FEATURES), jnp.float32, -bound, bound)
    # TODO(synk): original init runs curve2coeff (torch.linalg.lstsq) on noise;
    # not reproduced here since this is a synthetic deterministic init.

    # example input: (batch=2, seq=8, in_features=16), values in grid range
    x = jax.random.uniform(k_x, (2, 8, IN_FEATURES), jnp.float32, -1.0, 1.0)

    out = kan_linear(x, grid, base_weight, spline_weight, spline_scaler)
    out = jax.block_until_ready(out)

    ref = kan_linear_ref(x, grid, base_weight, spline_weight, spline_scaler)
    assert out.shape == (2, 8, OUT_FEATURES)
    # bf16 basis recursion (v6e/v7x) deviates ~1e-2 from the f32 reference
    tol = 1e-4 if _default_spline_dtype() == jnp.float32 else 5e-2
    assert jnp.allclose(out, ref, atol=tol, rtol=tol), (
        float(jnp.max(jnp.abs(out - ref))))

    print("KERNEL_OK")
</pallas_src>

<mosaic_0001>
module attributes {stable_mosaic.version = 11 : i64} {
  func.func @kan_linear_kernel(%arg0: i32, %arg1: memref<16x128xf32, #tpu.memory_space<vmem>>, %arg2: memref<12x16x128xf32, #tpu.memory_space<vmem>>, %arg3: memref<3x11x16x128xf32, #tpu.memory_space<vmem>>, %arg4: memref<32x16xf32, #tpu.memory_space<vmem>>, %arg5: memref<32x128xf32, #tpu.memory_space<vmem>>, %arg6: memref<32x128xf32, #tpu.memory_space<vmem>>) attributes {dimension_semantics = [#tpu.dimension_semantics<parallel>], iteration_bounds = array<i64: 1>, scalar_prefetch = 0 : i64, scratch_operands = 0 : i64, tpu.core_type = #tpu.core_type<tc>, window_params = [{transform_indices = @transform_0, window_bounds = array<i64: 16, 128>}, {pipeline_mode = #tpu.pipeline_mode<synchronous>, transform_indices = @transform_1, window_bounds = array<i64: 12, 16, 128>}, {pipeline_mode = #tpu.pipeline_mode<synchronous>, transform_indices = @transform_2, window_bounds = array<i64: 3, 11, 16, 128>}, {pipeline_mode = #tpu.pipeline_mode<synchronous>, transform_indices = @transform_3, window_bounds = array<i64: 32, 16>}, {pipeline_mode = #tpu.pipeline_mode<synchronous>, transform_indices = @transform_4, window_bounds = array<i64: 32, 128>}, {transform_indices = @transform_5, window_bounds = array<i64: 32, 128>}]} {
    %c0 = arith.constant 0 : index
    %c0_0 = arith.constant 0 : index
    %0 = vector.load %arg4[%c0, %c0_0] : memref<32x16xf32, #tpu.memory_space<vmem>>, vector<32x16xf32>
    %c0_1 = arith.constant 0 : index
    %c0_2 = arith.constant 0 : index
    %1 = vector.load %arg5[%c0_1, %c0_2] : memref<32x128xf32, #tpu.memory_space<vmem>>, vector<32x128xf32>
    %c0_3 = arith.constant 0 : index
    %c0_4 = arith.constant 0 : index
    %2 = vector.load %arg1[%c0_3, %c0_4] : memref<16x128xf32, #tpu.memory_space<vmem>>, vector<16x128xf32>
    %cst = arith.constant 0.000000e+00 : f32
    %3 = vector.broadcast %cst : f32 to vector<16x128xf32>
    %4 = arith.subf %3, %2 : vector<16x128xf32>
    %5 = math.exp %4 : vector<16x128xf32>
    %cst_5 = arith.constant 1.000000e+00 : f32
    %6 = vector.broadcast %cst_5 : f32 to vector<16x128xf32>
    %7 = arith.addf %6, %5 : vector<16x128xf32>
    %8 = tpu.reciprocal %7 : vector<16x128xf32> -> vector<16x128xf32>
    %9 = arith.mulf %2, %8 : vector<16x128xf32>
    %cst_6 = arith.constant dense<0.000000e+00> : vector<32x128xf32>
    %10 = tpu.matmul %0, %9, %cst_6 {dimension_numbers = #tpu.dot_dimension_numbers<[1], [0], [0], [1], [0, 0, 1, 1], [], []>} : vector<32x16xf32>, vector<16x128xf32>, vector<32x128xf32> -> vector<32x128xf32>
    %11 = vector.shape_cast %2 : vector<16x128xf32> to vector<1x16x128xf32>
    %c0_7 = arith.constant 0 : index
    %c0_8 = arith.constant 0 : index
    %c0_9 = arith.constant 0 : index
    %12 = vector.load %arg2[%c0_7, %c0_8, %c0_9] : memref<12x16x128xf32, #tpu.memory_space<vmem>>, vector<11x16x128xf32>
    %c1 = arith.constant 1 : index
    %c0_10 = arith.constant 0 : index
    %c0_11 = arith.constant 0 : index
    %13 = vector.load %arg2[%c1, %c0_10, %c0_11] : memref<12x16x128xf32, #tpu.memory_space<vmem>>, vector<11x16x128xf32>
    %14 = vector.broadcast %11 : vector<1x16x128xf32> to vector<11x16x128xf32>
    %15 = arith.cmpf oge, %14, %12 : vector<11x16x128xf32>
    %16 = vector.broadcast %11 : vector<1x16x128xf32> to vector<11x16x128xf32>
    %17 = arith.cmpf olt, %16, %13 : vector<11x16x128xf32>
    %18 = arith.andi %15, %17 : vector<11x16x128xi1>
    %19 = arith.extui %18 : vector<11x16x128xi1> to vector<11x16x128xi32>
    %20 = arith.sitofp %19 : vector<11x16x128xi32> to vector<11x16x128xf32>
    %c0_12 = arith.constant 0 : index
    %c0_13 = arith.constant 0 : index
    %c0_14 = arith.constant 0 : index
    %21 = vector.load %arg2[%c0_12, %c0_13, %c0_14] : memref<12x16x128xf32, #tpu.memory_space<vmem>>, vector<11x16x128xf32>
    %22 = vector.broadcast %11 : vector<1x16x128xf32> to vector<11x16x128xf32>
    %23 = arith.subf %22, %21 : vector<11x16x128xf32>
    %c0_15 = arith.constant 0 : index
    %c0_16 = arith.constant 0 : index
    %c0_17 = arith.constant 0 : index
    %c0_18 = arith.constant 0 : index
    %24 = vector.load %arg3[%c0_15, %c0_16, %c0_17, %c0_18] : memref<3x11x16x128xf32, #tpu.memory_space<vmem>>, vector<1x11x16x128xf32>
    %25 = vector.shape_cast %24 : vector<1x11x16x128xf32> to vector<11x16x128xf32>
    %26 = arith.mulf %23, %25 : vector<11x16x128xf32>
    %27 = vector.extract_strided_slice %26 {offsets = [0, 0, 0], sizes = [10, 16, 128], strides = [1, 1, 1]} : vector<11x16x128xf32> to vector<10x16x128xf32>
    %28 = vector.extract_strided_slice %20 {offsets = [0, 0, 0], sizes = [10, 16, 128], strides = [1, 1, 1]} : vector<11x16x128xf32> to vector<10x16x128xf32>
    %29 = arith.mulf %27, %28 : vector<10x16x128xf32>
    %30 = vector.extract_strided_slice %26 {offsets = [1, 0, 0], sizes = [10, 16, 128], strides = [1, 1, 1]} : vector<11x16x128xf32> to vector<10x16x128xf32>
    %cst_19 = arith.constant 1.000000e+00 : f32
    %31 = vector.broadcast %cst_19 : f32 to vector<10x16x128xf32>
    %32 = arith.subf %31, %30 : vector<10x16x128xf32>
    %33 = vector.extract_strided_slice %20 {offsets = [1, 0, 0], sizes = [10, 16, 128], strides = [1, 1, 1]} : vector<11x16x128xf32> to vector<10x16x128xf32>
    %34 = arith.mulf %32, %33 : vector<10x16x128xf32>
    %35 = arith.addf %29, %34 : vector<10x16x128xf32>
    %c0_20 = arith.constant 0 : index
    %c0_21 = arith.constant 0 : index
    %c0_22 = arith.constant 0 : index
    %36 = vector.load %arg2[%c0_20, %c0_21, %c0_22] : memref<12x16x128xf32, #tpu.memory_space<vmem>>, vector<10x16x128xf32>
    %37 = vector.broadcast %11 : vector<1x16x128xf32> to vector<10x16x128xf32>
    %38 = arith.subf %37, %36 : vector<10x16x128xf32>
    %c1_23 = arith.constant 1 : index
    %c0_24 = arith.constant 0 : index
    %c0_25 = arith.constant 0 : index
    %c0_26 = arith.constant 0 : index
    %39 = vector.load %arg3[%c1_23, %c0_24, %c0_25, %c0_26] : memref<3x11x16x128xf32, #tpu.memory_space<vmem>>, vector<1x10x16x128xf32>
    %40 = vector.shape_cast %39 : vector<1x10x16x128xf32> to vector<10x16x128xf32>
    %41 = arith.mulf %38, %40 : vector<10x16x128xf32>
    %42 = vector.extract_strided_slice %41 {offsets = [0, 0, 0], sizes = [9, 16, 128], strides = [1, 1, 1]} : vector<10x16x128xf32> to vector<9x16x128xf32>
    %43 = vector.extract_strided_slice %35 {offsets = [0, 0, 0], sizes = [9, 16, 128], strides = [1, 1, 1]} : vector<10x16x128xf32> to vector<9x16x128xf32>
    %44 = arith.mulf %42, %43 : vector<9x16x128xf32>
    %45 = vector.extract_strided_slice %41 {offsets = [1, 0, 0], sizes = [9, 16, 128], strides = [1, 1, 1]} : vector<10x16x128xf32> to vector<9x16x128xf32>
    %cst_27 = arith.constant 1.000000e+00 : f32
    %46 = vector.broadcast %cst_27 : f32 to vector<9x16x128xf32>
    %47 = arith.subf %46, %45 : vector<9x16x128xf32>
    %48 = vector.extract_strided_slice %35 {offsets = [1, 0, 0], sizes = [9, 16, 128], strides = [1, 1, 1]} : vector<10x16x128xf32> to vector<9x16x128xf32>
    %49 = arith.mulf %47, %48 : vector<9x16x128xf32>
    %50 = arith.addf %44, %49 : vector<9x16x128xf32>
    %c0_28 = arith.constant 0 : index
    %c0_29 = arith.constant 0 : index
    %c0_30 = arith.constant 0 : index
    %51 = vector.load %arg2[%c0_28, %c0_29, %c0_30] : memref<12x16x128xf32, #tpu.memory_space<vmem>>, vector<9x16x128xf32>
    %52 = vector.broadcast %11 : vector<1x16x128xf32> to vector<9x16x128xf32>
    %53 = arith.subf %52, %51 : vector<9x16x128xf32>
    %c2 = arith.constant 2 : index
    %c0_31 = arith.constant 0 : index
    %c0_32 = arith.constant 0 : index
    %c0_33 = arith.constant 0 : index
    %54 = vector.load %arg3[%c2, %c0_31, %c0_32, %c0_33] : memref<3x11x16x128xf32, #tpu.memory_space<vmem>>, vector<1x9x16x128xf32>
    %55 = vector.shape_cast %54 : vector<1x9x16x128xf32> to vector<9x16x128xf32>
    %56 = arith.mulf %53, %55 : vector<9x16x128xf32>
    %57 = vector.extract_strided_slice %56 {offsets = [0, 0, 0], sizes = [8, 16, 128], strides = [1, 1, 1]} : vector<9x16x128xf32> to vector<8x16x128xf32>
    %58 = vector.extract_strided_slice %50 {offsets = [0, 0, 0], sizes = [8, 16, 128], strides = [1, 1, 1]} : vector<9x16x128xf32> to vector<8x16x128xf32>
    %59 = arith.mulf %57, %58 : vector<8x16x128xf32>
    %60 = vector.extract_strided_slice %56 {offsets = [1, 0, 0], sizes = [8, 16, 128], strides = [1, 1, 1]} : vector<9x16x128xf32> to vector<8x16x128xf32>
    %cst_34 = arith.constant 1.000000e+00 : f32
    %61 = vector.broadcast %cst_34 : f32 to vector<8x16x128xf32>
    %62 = arith.subf %61, %60 : vector<8x16x128xf32>
    %63 = vector.extract_strided_slice %50 {offsets = [1, 0, 0], sizes = [8, 16, 128], strides = [1, 1, 1]} : vector<9x16x128xf32> to vector<8x16x128xf32>
    %64 = arith.mulf %62, %63 : vector<8x16x128xf32>
    %65 = arith.addf %59, %64 : vector<8x16x128xf32>
    %66 = vector.shape_cast %65 : vector<8x16x128xf32> to vector<128x128xf32>
    %cst_35 = arith.constant dense<0.000000e+00> : vector<32x128xf32>
    %67 = tpu.matmul %1, %66, %cst_35 {dimension_numbers = #tpu.dot_dimension_numbers<[1], [0], [0], [1], [0, 0, 1, 1], [], []>} : vector<32x128xf32>, vector<128x128xf32>, vector<32x128xf32> -> vector<32x128xf32>
    %68 = arith.addf %10, %67 : vector<32x128xf32>
    %c0_36 = arith.constant 0 : index
    %c0_37 = arith.constant 0 : index
    %69 = vector.load %arg6[%c0_36, %c0_37] : memref<32x128xf32, #tpu.memory_space<vmem>>, vector<32x128xf32>
    tpu.vector_store %arg6[%c0_36, %c0_37], %68 {strides = array<i32>} : memref<32x128xf32, #tpu.memory_space<vmem>>, vector<32x128xf32>,
    return
  }
  func.func @transform_0(%arg0: i32) -> (i32, i32) {
    %c0_i32 = arith.constant 0 : i32
    %c0_i32_0 = arith.constant 0 : i32
    return %c0_i32, %arg0 : i32, i32
  }
  func.func @transform_1(%arg0: i32) -> (i32, i32, i32) {
    %c0_i32 = arith.constant 0 : i32
    %c0_i32_0 = arith.constant 0 : i32
    %c0_i32_1 = arith.constant 0 : i32
    %c0_i32_2 = arith.constant 0 : i32
    return %c0_i32, %c0_i32_0, %c0_i32_1 : i32, i32, i32
  }
  func.func @transform_2(%arg0: i32) -> (i32, i32, i32, i32) {
    %c0_i32 = arith.constant 0 : i32
    %c0_i32_0 = arith.constant 0 : i32
    %c0_i32_1 = arith.constant 0 : i32
    %c0_i32_2 = arith.constant 0 : i32
    %c0_i32_3 = arith.constant 0 : i32
    return %c0_i32, %c0_i32_0, %c0_i32_1, %c0_i32_2 : i32, i32, i32, i32
  }
  func.func @transform_3(%arg0: i32) -> (i32, i32) {
    %c0_i32 = arith.constant 0 : i32
    %c0_i32_0 = arith.constant 0 : i32
    %c0_i32_1 = arith.constant 0 : i32
    return %c0_i32, %c0_i32_0 : i32, i32
  }
  func.func @transform_4(%arg0: i32) -> (i32, i32) {
    %c0_i32 = arith.constant 0 : i32
    %c0_i32_0 = arith.constant 0 : i32
    %c0_i32_1 = arith.constant 0 : i32
    return %c0_i32, %c0_i32_0 : i32, i32
  }
  func.func @transform_5(%arg0: i32) -> (i32, i32) {
    %c0_i32 = arith.constant 0 : i32
    %c0_i32_0 = arith.constant 0 : i32
    return %c0_i32, %arg0 : i32, i32
  }
}

</mosaic_0001>

<bundles_post_ra>
// kernel: tpu_custom_call.1
= control target key start
LH: loop header
LB: loop body
LE: loop exit
PB: predicated region body
PF: predicated region fallthrough
CT: control target
= control target key end

     0   :  { %10 = vsyncpa [#allocation3], 0  ;;  %s1341_s0 = inlined_call_operand.vmem [shape: f32[16,128], index: 0, kind: input, shape index: {}]   ;;  %s1342_s1 = inlined_call_operand.hbm [shape: f32[12,16,128], index: 1, kind: input, shape index: {}]   ;;  %s1343_s2 = inlined_call_operand.hbm [shape: f32[3,11,16,128], index: 2, kind: input, shape index: {}]   ;;  %s1344_s3 = inlined_call_operand.vmem [shape: f32[32,16], index: 3, kind: input, shape index: {}]   ;;  %s1345_s4 = inlined_call_operand.vmem [shape: f32[32,128], index: 4, kind: input, shape index: {}]   ;;  %s1346_s5 = inlined_call_operand.hbm [shape: f32[32,128], index: 5, kind: output, shape index: {}]  }
   0x1   :  { %11 = vsyncpa [#allocation6], 0 }
   0x2   :  { %12 = vsyncpa [#allocation4], 0  ;;  %s19_s20 = sshll.u32 %s1342_s1, 4  ;;  %s861_s21 = smov [#allocation2]   ;;  %s20_s20 = int_to_ptr.hbm [resolvable:$true] %s19_s20 }
   0x3   :  { %s21_s22 = sshll.u32 %s861_s21, 4  ;;  %s32_s25 = sshll.u32 %s1343_s2, 4  ;;  %s22_s22 = int_to_ptr.vmem [resolvable:$true] %s21_s22  ;;  %s33_s25 = int_to_ptr.hbm [resolvable:$true] %s32_s25 }
   0x4   :  { %s862_s26 = smov 128   ;;  %s863_s27 = smov 8  }
   0x5   :  { %27 = dma.hbm_to_vmem [thread:$0]  %s20_s20, 3072, %s22_s22, [#allocation3], %s862_s26, %s862_s26, %s863_s27  }
   0x6   :  { %s864_s28 = smov [#allocation5]  }
   0x7   :  { %s34_s29 = sshll.u32 %s864_s28, 4  ;;  %s35_s29 = int_to_ptr.vmem [resolvable:$true] %s34_s29 }
   0x8   :  { %40 = dma.hbm_to_vmem [thread:$0]  %s33_s25, 8448, %s35_s29, [#allocation6], %s862_s26, %s862_s26, %s863_s27  }
   0x9   :  { %855 = dma.done.wait [#allocation3], 3072  }
   0xa   :  { %856 = vsyncadd [#allocation3], 4294964224 }
   0xb   :  { %857 = dma.done.wait [#allocation6], 8448  }
   0xc   :  { %858 = vsyncadd [#allocation6], 4294958848  ;;  %v912_v0 = vld [vmem:[%s1341_s0 + $0x8] sm:$0xff]  ;;  %v914_v1 = vld [vmem:[#allocation2 + $0x78] sm:$0xff]  ;;  %v865_v9 = vmov 0.0  }
   0xd   :  { %v118_v2 = vld [vmem:[#allocation2 + $0x88] sm:$0xff]  ;;  %v120_v3 = vld [vmem:[#allocation2 + $0x98] sm:$0xff]  ;;  %vm161_vm0 = vcmp.ge.f32.partialorder %v912_v0, %v914_v1  ;;  %v271_v6 = vsub.f32 %v912_v0, %v914_v1  ;;  %v946_v31 = vld [vmem:[#allocation2 + $0x70] sm:$0xff] }
   0xe   :  { %v122_v4 = vld [vmem:[#allocation2 + $0xa8] sm:$0xff]  ;;  %v145_v5 = vld [vmem:[#allocation2 + $0xb8] sm:$0xff]  ;;  %vm163_vm1 = vcmp.ge.f32.partialorder %v912_v0, %v118_v2  ;;  %vm183_vm2 = vcmp.lt.f32.partialorder %v912_v0, %v118_v2  ;;  %vm165_vm3 = vcmp.ge.f32.partialorder %v912_v0, %v120_v3  ;;  %vm185_vm5 = vcmp.lt.f32.partialorder %v912_v0, %v120_v3  ;;  %v953_v40 = vld [vmem:[%s1341_s0] sm:$0xff] }
   0xf   :  { %vm167_vm4 = vcmp.ge.f32.partialorder %v912_v0, %v122_v4  ;;  %vm187_vm6 = vcmp.lt.f32.partialorder %v912_v0, %v122_v4  ;;  %vm205_vm7 = vmand %vm161_vm0, %vm183_vm2  ;;  %v293_v7 = vld [vmem:[#allocation5 + $0x78] sm:$0xff]  ;;  %v295_v8 = vld [vmem:[#allocation5 + $0x88] sm:$0xff]  ;;  %vm189_vm8 = vcmp.lt.f32.partialorder %v912_v0, %v145_v5  ;;  %v273_v11 = vsub.f32 %v912_v0, %v118_v2 }
  0x10   :  { %vm207_vm9 = vmand %vm163_vm1, %vm185_vm5  ;;  %v928_v10 = vsel %vm205_vm7, 1.0, %v865_v9  ;;  %v275_v12 = vsub.f32 %v912_v0, %v120_v3  ;;  %v297_v13 = vld [vmem:[#allocation5 + $0x98] sm:$0xff]  ;;  %v299_v14 = vld [vmem:[#allocation5 + $0xa8] sm:$0xff]  ;;  %v277_v16 = vsub.f32 %v912_v0, %v122_v4  ;;  %v936_v17 = vmul.f32 %v293_v7, %v271_v6 }
  0x11   :  { %vm209_vm10 = vmand %vm165_vm3, %vm187_vm6  ;;  %v728_v15 = vsel %vm207_vm9, 1.0, %v865_v9  ;;  %v418_v18 = vld [vmem:[#allocation5 + $0x128] sm:$0xff]  ;;  %v420_v19 = vld [vmem:[#allocation5 + $0x138] sm:$0xff]  ;;  %v317_v21 = vmul.f32 %v295_v8, %v273_v11  ;;  %vm160_vm12 = vcmp.ge.f32.partialorder %v953_v40, %v946_v31  ;;  %vm181_vm3 = vcmp.lt.f32.partialorder %v912_v0, %v914_v1 }
  0x12   :  { %vm211_vm11 = vmand %vm167_vm4, %vm189_vm8  ;;  %v730_v20 = vsel %vm209_vm10, 1.0, %v865_v9  ;;  %v319_v22 = vmul.f32 %v297_v13, %v275_v12  ;;  %v422_v23 = vld [vmem:[#allocation5 + $0x148] sm:$0xff]  ;;  %v941_v24 = vmul.f32 %v418_v18, %v271_v6  ;;  %v531_v25 = vld [vmem:[#allocation5 + $0x1d8] sm:$0xff]  ;;  %v321_v27 = vmul.f32 %v299_v14, %v277_v16 }
  0x13   :  { %v732_v26 = vsel %vm211_vm11, 1.0, %v865_v9  ;;  %v337_v28 = vmul.f32 %v928_v10, %v936_v17  ;;  %v440_v29 = vmul.f32 %v420_v19, %v273_v11  ;;  %v533_v30 = vld [vmem:[#allocation5 + $0x1e8] sm:$0xff]  ;;  %v339_v32 = vmul.f32 %v728_v15, %v317_v21  ;;  %v117_v44 = vld [vmem:[#allocation2 + $0x80] sm:$0xff]  ;;  %v119_v45 = vld [vmem:[#allocation2 + $0x90] sm:$0xff] }
  0x14   :  { %v341_v33 = vmul.f32 %v730_v20, %v319_v22  ;;  %v357_v34 = vsub.f32 1.0, %v317_v21  ;;  %v359_v35 = vsub.f32 1.0, %v319_v22  ;;  %v361_v36 = vsub.f32 1.0, %v321_v27  ;;  %v121_v48 = vld [vmem:[#allocation2 + $0xa0] sm:$0xff]  ;;  %v144_v49 = vld [vmem:[#allocation2 + $0xb0] sm:$0xff] }
  0x15   :  { %v442_v37 = vmul.f32 %v422_v23, %v275_v12  ;;  %v476_v38 = vsub.f32 1.0, %v440_v29  ;;  %v948_v39 = vmul.f32 %v531_v25, %v271_v6  ;;  %v551_v43 = vmul.f32 %v533_v30, %v273_v11  ;;  %v292_v57 = vld [vmem:[#allocation5 + $0x70] sm:$0xff]  ;;  %v294_v58 = vld [vmem:[#allocation5 + $0x80] sm:$0xff] }
  0x16   :  { %v377_v41 = vmul.f32 %v728_v15, %v357_v34  ;;  %v379_v42 = vmul.f32 %v730_v20, %v359_v35  ;;  %v381_v46 = vmul.f32 %v732_v26, %v361_v36  ;;  %vm162_vm13 = vcmp.ge.f32.partialorder %v953_v40, %v117_v44  ;;  %v296_v63 = vld [vmem:[#allocation5 + $0x90] sm:$0xff]  ;;  %v298_v2 = vld [vmem:[#allocation5 + $0xa0] sm:$0xff] }
  0x17   :  { %v478_v47 = vsub.f32 1.0, %v442_v37  ;;  %vm164_vm14 = vcmp.ge.f32.partialorder %v953_v40, %v119_v45  ;;  %v583_v52 = vsub.f32 1.0, %v551_v43  ;;  %vm166_vm15 = vcmp.ge.f32.partialorder %v953_v40, %v121_v48  ;;  %v417_v13 = vld [vmem:[#allocation5 + $0x120] sm:$0xff]  ;;  %v419_v19 = vld [vmem:[#allocation5 + $0x130] sm:$0xff] }
  0x18   :  { %v959_v50 = vadd.f32 %v377_v41, %v337_v28  ;;  %v399_v51 = vadd.f32 %v379_v42, %v339_v32  ;;  %v401_v53 = vadd.f32 %v381_v46, %v341_v33  ;;  %vm182_vm0 = vcmp.lt.f32.partialorder %v953_v40, %v117_v44  ;;  %v421_v20 = vld [vmem:[#allocation5 + $0x140] sm:$0xff]  ;;  %v530_v26 = vld [vmem:[#allocation5 + $0x1d0] sm:$0xff]  ;;  %v1004_v33 = vld [vmem:[#allocation2 + $0x68] sm:$0xff] }
  0x19   :  { %vm184_vm1 = vcmp.lt.f32.partialorder %v953_v40, %v119_v45  ;;  %vm186_vm2 = vcmp.lt.f32.partialorder %v953_v40, %v121_v48  ;;  %vm188_vm4 = vcmp.lt.f32.partialorder %v953_v40, %v144_v49  ;;  %vm204_vm5 = vmand %vm160_vm12, %vm182_vm0  ;;  %v270_v61 = vsub.f32 %v953_v40, %v946_v31  ;;  %v532_v27 = vld [vmem:[#allocation5 + $0x1e0] sm:$0xff] }
  0x1a   :  { %v458_v54 = vmul.f32 %v941_v24, %v959_v50  ;;  %v460_v55 = vmul.f32 %v440_v29, %v399_v51  ;;  %v494_v56 = vmul.f32 %v476_v38, %v399_v51  ;;  %v496_v59 = vmul.f32 %v478_v47, %v401_v53  ;;  %vm206_vm6 = vmand %vm162_vm13, %vm184_vm1  ;;  %v291_v47 = vld [vmem:[#allocation5 + $0x68] sm:$0xff]  ;;  %v416_v53 = vld [vmem:[#allocation5 + $0x118] sm:$0xff] }
  0x1b   :  { %v976_v60 = vsel %vm204_vm5, 1.0, %v865_v9  ;;  %v272_v62 = vsub.f32 %v953_v40, %v117_v44  ;;  %vm208_vm7 = vmand %vm164_vm14, %vm186_vm2  ;;  %v727_v4 = vsel %vm206_vm6, 1.0, %v865_v9  ;;  %v274_v5 = vsub.f32 %v953_v40, %v119_v45 }
  0x1c   :  { %v981_v3 = vadd.f32 %v494_v56, %v458_v54  ;;  %v276_v6 = vsub.f32 %v953_v40, %v121_v48  ;;  %v514_v7 = vadd.f32 %v496_v59, %v460_v55  ;;  %vm210_vm8 = vmand %vm166_vm15, %vm188_vm4  ;;  %v729_v8 = vsel %vm208_vm7, 1.0, %v865_v9 }
  0x1d   :  { %v995_v11 = vmul.f32 %v292_v57, %v270_v61  ;;  %v316_v12 = vmul.f32 %v294_v58, %v272_v62  ;;  %v731_v15 = vsel %vm210_vm8, 1.0, %v865_v9  ;;  %v318_v16 = vmul.f32 %v296_v63, %v274_v5  ;;  %v1022_v63 = vld [vmem:[#allocation2 + $0x60] sm:$0xff] }
  0x1e   :  { %v567_v14 = vmul.f32 %v948_v39, %v981_v3  ;;  %v320_v18 = vmul.f32 %v298_v2, %v276_v6  ;;  %v599_v21 = vmul.f32 %v583_v52, %v514_v7  ;;  %v1002_v32 = vmul.f32 %v417_v13, %v270_v61 }
  0x1f   :  { %v336_v22 = vmul.f32 %v976_v60, %v995_v11  ;;  %v338_v23 = vmul.f32 %v727_v4, %v316_v12  ;;  %v356_v25 = vsub.f32 1.0, %v316_v12  ;;  %v340_v28 = vmul.f32 %v729_v8, %v318_v16  ;;  %v290_v12 = vld [vmem:[#allocation5 + $0x60] sm:$0xff] }
  0x20   :  { %v358_v29 = vsub.f32 1.0, %v318_v16  ;;  %v360_v30 = vsub.f32 1.0, %v320_v18  ;;  %v615_v34 = vadd.f32 %v599_v21, %v567_v14  ;;  %v439_v36 = vmul.f32 %v419_v19, %v272_v62  ;;  %v1035_v16 = vld [vmem:[#allocation2 + $0x58] sm:$0xff] }
  0x21   :  { %v376_v35 = vmul.f32 %v727_v4, %v356_v25  ;;  %v441_v37 = vmul.f32 %v421_v20, %v274_v5  ;;  %v1006_v42 = vmul.f32 %v530_v26, %v270_v61  ;;  %v550_v43 = vmul.f32 %v532_v27, %v272_v62  ;;  %v528_v26 = vld [vmem:[#allocation5 + $0x1c0] sm:$0xff] }
  0x22   :  { %v378_v38 = vmul.f32 %v729_v8, %v358_v29  ;;  %v380_v41 = vmul.f32 %v731_v15, %v360_v30  ;;  %616 = vmatpush.msra.mxu0 %v615_v34  ;;  %737 = vmatpush.msra.mxu2 %v615_v34  ;;  %v475_v45 = vsub.f32 1.0, %v439_v36  ;;  %vm159_vm9 = vcmp.ge.f32.partialorder %v912_v0, %v1004_v33  ;;  %v529_v8 = vld [vmem:[#allocation5 + $0x1c8] sm:$0xff] }
  0x23   :  { %v1008_v44 = vadd.f32 %v376_v35, %v336_v22  ;;  %v477_v46 = vsub.f32 1.0, %v441_v37  ;;  %738 = vmatpush.msra.mxu3 %v615_v34  ;;  %v582_v51 = vsub.f32 1.0, %v550_v43  ;;  %vm203_vm10 = vmand %vm159_vm9, %vm181_vm3  ;;  %v269_v52 = vsub.f32 %v912_v0, %v1004_v33 }
  0x24   :  { %v398_v48 = vadd.f32 %v378_v38, %v338_v23  ;;  %v400_v49 = vadd.f32 %v380_v41, %v340_v28  ;;  %v724_v55 = vsel %vm203_vm10, 1.0, %v865_v9  ;;  %v355_v56 = vsub.f32 1.0, %v936_v17 }
  0x25   :  { %v457_v54 = vmul.f32 %v1002_v32, %v1008_v44  ;;  %v474_v57 = vsub.f32 1.0, %v941_v24  ;;  %v313_v62 = vmul.f32 %v291_v47, %v269_v52  ;;  %v436_v2 = vmul.f32 %v416_v53, %v269_v52  ;;  %v527_v47 = vld [vmem:[#allocation5 + $0x1b8] sm:$0xff] }
  0x26   :  { %v459_v58 = vmul.f32 %v439_v36, %v398_v48  ;;  %v493_v59 = vmul.f32 %v475_v45, %v398_v48  ;;  %v495_v61 = vmul.f32 %v477_v46, %v400_v49  ;;  %v375_v1 = vmul.f32 %v928_v10, %v355_v56  ;;  %v415_v10 = vld [vmem:[#allocation5 + $0x110] sm:$0xff]  ;;  %v413_v56 = vld [vmem:[#allocation5 + $0x100] sm:$0xff] }
  0x27   :  { %v335_v6 = vmul.f32 %v724_v55, %v313_v62  ;;  %v492_v7 = vmul.f32 %v474_v57, %v959_v50  ;;  %vm158_vm11 = vcmp.ge.f32.partialorder %v953_v40, %v1022_v63  ;;  %vm180_vm12 = vcmp.lt.f32.partialorder %v953_v40, %v946_v31 }
  0x28   :  { %v511_v4 = vadd.f32 %v493_v59, %v457_v54  ;;  %v513_v5 = vadd.f32 %v495_v61, %v459_v58  ;;  %v268_v17 = vsub.f32 %v953_v40, %v1022_v63  ;;  %v354_v24 = vsub.f32 1.0, %v995_v11  ;;  %vm202_vm13 = vmand %vm158_vm11, %vm180_vm12 }
  0x29   :  { %v395_v15 = vadd.f32 %v375_v1, %v335_v6  ;;  %v581_v50 = vsub.f32 1.0, %v948_v39  ;;  %v547_v18 = vmul.f32 %v529_v8, %v269_v52  ;;  %v723_v19 = vsel %vm202_vm13, 1.0, %v865_v9  ;;  %v289_v39 = vld [vmem:[#allocation5 + $0x58] sm:$0xff]  ;;  %v526_v8 = vld [vmem:[#allocation5 + $0x1b0] sm:$0xff] }
  0x2a   :  { %v566_v13 = vmul.f32 %v1006_v42, %v511_v4  ;;  %v598_v14 = vmul.f32 %v582_v51, %v513_v5  ;;  %v312_v20 = vmul.f32 %v290_v12, %v268_v17  ;;  %v374_v31 = vmul.f32 %v976_v60, %v354_v24 }
  0x2b   :  { %v456_v22 = vmul.f32 %v436_v2, %v395_v15  ;;  %v435_v23 = vmul.f32 %v415_v10, %v268_v17  ;;  %v473_v11 = vsub.f32 1.0, %v1002_v32  ;;  %v580_v27 = vsub.f32 1.0, %v1006_v42  ;;  %v414_v32 = vld [vmem:[#allocation5 + $0x108] sm:$0xff] }
  0x2c   :  { %v614_v21 = vadd.f32 %v598_v14, %v566_v13  ;;  %v334_v25 = vmul.f32 %v723_v19, %v312_v20  ;;  %vm157_vm14 = vcmp.ge.f32.partialorder %v912_v0, %v1035_v16  ;;  %vm179_vm15 = vcmp.lt.f32.partialorder %v912_v0, %v1004_v33  ;;  %v1050_v33 = vld [vmem:[#allocation2 + $0x50] sm:$0xff]  ;;  %v287_v10 = vld [vmem:[#allocation5 + $0x48] sm:$0xff]  ;;  %v1065_v13 = vld [vmem:[#allocation2 + $0x40] sm:$0xff] }
  0x2d   :  { %v510_v28 = vadd.f32 %v492_v7, %v456_v22  ;;  %v597_v60 = vmul.f32 %v581_v50, %v981_v3  ;;  %vm201_vm0 = vmand %vm157_vm14, %vm179_vm15  ;;  %v267_v29 = vsub.f32 %v912_v0, %v1035_v16  ;;  %v353_v30 = vsub.f32 1.0, %v313_v62  ;;  %v1059_v62 = vld [vmem:[#allocation2 + $0x48] sm:$0xff] }
  0x2e   :  { %617 = vmatpush.msra.mxu0 %v614_v21  ;;  %739 = vmatpush.msra.mxu2 %v614_v21  ;;  %v394_v34 = vadd.f32 %v374_v31, %v334_v25  ;;  %v491_v35 = vmul.f32 %v473_v11, %v1008_v44  ;;  %v722_v36 = vsel %vm201_vm0, 1.0, %v865_v9  ;;  %v472_v37 = vsub.f32 1.0, %v436_v2  ;;  %v288_v44 = vld [vmem:[#allocation5 + $0x50] sm:$0xff]  ;;  %v525_v25 = vld [vmem:[#allocation5 + $0x1a8] sm:$0xff] }
  0x2f   :  { %740 = vmatpush.msra.mxu3 %v614_v21  ;;  %v565_v38 = vmul.f32 %v547_v18, %v510_v28  ;;  %v546_v41 = vmul.f32 %v528_v26, %v268_v17  ;;  %v311_v42 = vmul.f32 %v289_v39, %v267_v29  ;;  %v373_v43 = vmul.f32 %v724_v55, %v353_v30 }
  0x30   :  { %v455_v3 = vmul.f32 %v435_v23, %v394_v34  ;;  %v596_v45 = vmul.f32 %v580_v27, %v511_v4  ;;  %v434_v46 = vmul.f32 %v414_v32, %v267_v29  ;;  %v579_v48 = vsub.f32 1.0, %v547_v18  ;;  %v412_v18 = vld [vmem:[#allocation5 + $0xf8] sm:$0xff] }
  0x31   :  { %v613_v49 = vadd.f32 %v597_v60, %v565_v38  ;;  %v333_v51 = vmul.f32 %v722_v36, %v311_v42  ;;  %vm156_vm1 = vcmp.ge.f32.partialorder %v953_v40, %v1050_v33  ;;  %vm178_vm2 = vcmp.lt.f32.partialorder %v953_v40, %v1022_v63  ;;  %v286_v60 = vld [vmem:[#allocation5 + $0x40] sm:$0xff] }
  0x32   :  { %v509_v52 = vadd.f32 %v491_v35, %v455_v3  ;;  %v490_v53 = vmul.f32 %v472_v37, %v395_v15  ;;  %vm200_vm3 = vmand %vm156_vm1, %vm178_vm2  ;;  %v266_v54 = vsub.f32 %v953_v40, %v1050_v33  ;;  %v352_v55 = vsub.f32 1.0, %v312_v20 }
  0x33   :  { %618 = vmatpush.msra.mxu0 %v613_v49  ;;  %741 = vmatpush.msra.mxu2 %v613_v49  ;;  %v393_v57 = vadd.f32 %v373_v43, %v333_v51  ;;  %v545_v58 = vmul.f32 %v527_v47, %v267_v29  ;;  %v721_v59 = vsel %vm200_vm3, 1.0, %v865_v9  ;;  %v471_v61 = vsub.f32 1.0, %v435_v23 }
  0x34   :  { %742 = vmatpush.msra.mxu3 %v613_v49  ;;  %v564_v63 = vmul.f32 %v546_v41, %v509_v52  ;;  %v595_v1 = vmul.f32 %v579_v48, %v510_v28  ;;  %v310_v2 = vmul.f32 %v288_v44, %v266_v54  ;;  %v372_v4 = vmul.f32 %v723_v19, %v352_v55  ;;  %v524_v48 = vld [vmem:[#allocation5 + $0x1a0] sm:$0xff] }
  0x35   :  { %v454_v5 = vmul.f32 %v434_v46, %v393_v57  ;;  %v433_v6 = vmul.f32 %v413_v56, %v266_v54  ;;  %v489_v7 = vmul.f32 %v471_v61, %v394_v34  ;;  %v578_v12 = vsub.f32 1.0, %v546_v41  ;;  %v411_v34 = vld [vmem:[#allocation5 + $0xf0] sm:$0xff]  ;;  %v1078_v41 = vld [vmem:[#allocation2 + $0x38] sm:$0xff] }
  0x36   :  { %v612_v17 = vadd.f32 %v596_v45, %v564_v63  ;;  %v332_v24 = vmul.f32 %v721_v59, %v310_v2  ;;  %vm155_vm4 = vcmp.ge.f32.partialorder %v912_v0, %v1059_v62  ;;  %vm177_vm5 = vcmp.lt.f32.partialorder %v912_v0, %v1035_v16 }
  0x37   :  { %v508_v14 = vadd.f32 %v490_v53, %v454_v5  ;;  %vm199_vm6 = vmand %vm155_vm4, %vm177_vm5  ;;  %v265_v15 = vsub.f32 %v912_v0, %v1059_v62  ;;  %v351_v50 = vsub.f32 1.0, %v311_v42  ;;  %v470_v19 = vsub.f32 1.0, %v434_v46  ;;  %v285_v53 = vld [vmem:[#allocation5 + $0x38] sm:$0xff] }
  0x38   :  { %619 = vmatpush.msra.mxu0 %v612_v17  ;;  %743 = vmatpush.msra.mxu2 %v612_v17  ;;  %v392_v20 = vadd.f32 %v372_v4, %v332_v24  ;;  %v544_v31 = vmul.f32 %v526_v8, %v266_v54  ;;  %v720_v21 = vsel %vm199_vm6, 1.0, %v865_v9  ;;  %v577_v22 = vsub.f32 1.0, %v545_v58 }
  0x39   :  { %744 = vmatpush.msra.mxu3 %v612_v17  ;;  %v563_v16 = vmul.f32 %v545_v58, %v508_v14  ;;  %v309_v23 = vmul.f32 %v287_v10, %v265_v15  ;;  %v371_v11 = vmul.f32 %v722_v36, %v351_v50  ;;  %vm154_vm7 = vcmp.ge.f32.partialorder %v953_v40, %v1065_v13 }
  0x3a   :  { %v453_v26 = vmul.f32 %v433_v6, %v392_v20  ;;  %v594_v27 = vmul.f32 %v578_v12, %v509_v52  ;;  %v432_v39 = vmul.f32 %v412_v18, %v265_v15  ;;  %v488_v28 = vmul.f32 %v470_v19, %v393_v57  ;;  %v410_v57 = vld [vmem:[#allocation5 + $0xe8] sm:$0xff]  ;;  %v523_v12 = vld [vmem:[#allocation5 + $0x198] sm:$0xff] }
  0x3b   :  { %v611_v29 = vadd.f32 %v595_v1, %v563_v16  ;;  %v331_v30 = vmul.f32 %v720_v21, %v309_v23  ;;  %vm176_vm8 = vcmp.lt.f32.partialorder %v953_v40, %v1050_v33  ;;  %v264_v32 = vsub.f32 %v953_v40, %v1065_v13  ;;  %v1089_v1 = vld [vmem:[#allocation2 + $0x30] sm:$0xff] }
  0x3c   :  { %v507_v35 = vadd.f32 %v489_v7, %v453_v26  ;;  %v1076_v36 = vmul.f32 %v525_v25, %v265_v15  ;;  %vm198_vm9 = vmand %vm154_vm7, %vm176_vm8  ;;  %v350_v37 = vsub.f32 1.0, %v310_v2  ;;  %v469_v38 = vsub.f32 1.0, %v433_v6  ;;  %v1111_v26 = vld [vmem:[#allocation2 + $0x28] sm:$0xff] }
  0x3d   :  { %620 = vmatpush.msra.mxu0 %v611_v29  ;;  %745 = vmatpush.msra.mxu2 %v611_v29  ;;  %v391_v42 = vadd.f32 %v371_v11, %v331_v30  ;;  %v593_v43 = vmul.f32 %v577_v22, %v508_v14  ;;  %v719_v3 = vsel %vm198_vm9, 1.0, %v865_v9  ;;  %v308_v45 = vmul.f32 %v286_v60, %v264_v32  ;;  %v284_v14 = vld [vmem:[#allocation5 + $0x30] sm:$0xff] }
  0x3e   :  { %746 = vmatpush.msra.mxu3 %v611_v29  ;;  %v562_v33 = vmul.f32 %v544_v31, %v507_v35  ;;  %v370_v46 = vmul.f32 %v721_v59, %v350_v37  ;;  %v431_v47 = vmul.f32 %v411_v34, %v264_v32  ;;  %v576_v49 = vsub.f32 1.0, %v544_v31  ;;  %v522_v37 = vld [vmem:[#allocation5 + $0x190] sm:$0xff] }
  0x3f   :  { %v452_v51 = vmul.f32 %v432_v39, %v391_v42  ;;  %v330_v44 = vmul.f32 %v719_v3, %v308_v45  ;;  %v487_v52 = vmul.f32 %v469_v38, %v392_v20  ;;  %vm153_vm10 = vcmp.ge.f32.partialorder %v912_v0, %v1078_v41  ;;  %v409_v20 = vld [vmem:[#allocation5 + $0xe0] sm:$0xff] }
  0x40   :  { %v610_v54 = vadd.f32 %v594_v27, %v562_v33  ;;  %vm175_vm11 = vcmp.lt.f32.partialorder %v912_v0, %v1059_v62  ;;  %v263_v55 = vsub.f32 %v912_v0, %v1078_v41  ;;  %v349_v56 = vsub.f32 1.0, %v309_v23 }
  0x41   :  { %v506_v58 = vadd.f32 %v488_v28, %v452_v51  ;;  %v390_v59 = vadd.f32 %v370_v46, %v330_v44  ;;  %v1087_v61 = vmul.f32 %v524_v48, %v264_v32  ;;  %vm197_vm12 = vmand %vm153_vm10, %vm175_vm11  ;;  %v468_v63 = vsub.f32 1.0, %v432_v39 }
  0x42   :  { %621 = vmatpush.msra.mxu0 %v610_v54  ;;  %747 = vmatpush.msra.mxu2 %v610_v54  ;;  %v592_v2 = vmul.f32 %v576_v49, %v507_v35  ;;  %v718_v4 = vsel %vm197_vm12, 1.0, %v865_v9  ;;  %v307_v5 = vmul.f32 %v285_v53, %v263_v55  ;;  %v369_v62 = vmul.f32 %v720_v21, %v349_v56  ;;  %v283_v35 = vld [vmem:[#allocation5 + $0x28] sm:$0xff] }
  0x43   :  { %748 = vmatpush.msra.mxu3 %v610_v54  ;;  %v561_v6 = vmul.f32 %v1076_v36, %v506_v58  ;;  %v451_v7 = vmul.f32 %v431_v47, %v390_v59  ;;  %v1093_v8 = vmul.f32 %v410_v57, %v263_v55  ;;  %v575_v17 = vsub.f32 1.0, %v1076_v36 }
  0x44   :  { %v329_v24 = vmul.f32 %v718_v4, %v307_v5  ;;  %v486_v10 = vmul.f32 %v468_v63, %v391_v42  ;;  %vm152_vm13 = vcmp.ge.f32.partialorder %v953_v40, %v1089_v1  ;;  %vm174_vm14 = vcmp.lt.f32.partialorder %v953_v40, %v1065_v13 }
  0x45   :  { %v609_v15 = vadd.f32 %v593_v43, %v561_v6  ;;  %v505_v50 = vadd.f32 %v487_v52, %v451_v7  ;;  %vm196_vm15 = vmand %vm152_vm13, %vm174_vm14  ;;  %v262_v18 = vsub.f32 %v953_v40, %v1089_v1  ;;  %v348_v19 = vsub.f32 1.0, %v308_v45  ;;  %v407_v7 = vld [vmem:[#allocation5 + $0xd0] sm:$0xff] }
  0x46   :  { %v389_v31 = vadd.f32 %v369_v62, %v329_v24  ;;  %v1102_v21 = vmul.f32 %v523_v12, %v263_v55  ;;  %v1105_v22 = vsel %vm196_vm15, 1.0, %v865_v9  ;;  %v467_v16 = vsub.f32 1.0, %v431_v47 }
  0x47   :  { %622 = vmatpush.msra.mxu0 %v609_v15  ;;  %749 = vmatpush.msra.mxu2 %v609_v15  ;;  %v560_v13 = vmul.f32 %v1087_v61, %v505_v50  ;;  %v1108_v23 = vmul.f32 %v284_v14, %v262_v18  ;;  %v368_v11 = vmul.f32 %v719_v3, %v348_v19  ;;  %v64_v25 = vsub.f32 0.0, %v912_v0  ;;  %v408_v3 = vld [vmem:[#allocation5 + $0xd8] sm:$0xff] }
  0x48   :  { %750 = vmatpush.msra.mxu3 %v609_v15  ;;  %v450_v27 = vmul.f32 %v1093_v8, %v389_v31  ;;  %v591_v39 = vmul.f32 %v575_v17, %v506_v58  ;;  %v1114_v28 = vmul.f32 %v409_v20, %v262_v18  ;;  %v574_v60 = vsub.f32 1.0, %v1087_v61  ;;  %v282_v58 = vld [vmem:[#allocation5 + $0x20] sm:$0xff]  ;;  %v521_v61 = vld [vmem:[#allocation5 + $0x188] sm:$0xff] }
  0x49   :  { %v608_v29 = vadd.f32 %v592_v2, %v560_v13  ;;  %v328_v30 = vmul.f32 %v1105_v22, %v1108_v23  ;;  %v485_v32 = vmul.f32 %v467_v16, %v390_v59  ;;  %v67_v34 = vmul.f32 1.442695, %v64_v25 }
  0x4a   :  { %v504_v36 = vadd.f32 %v486_v10, %v450_v27  ;;  %vm151_vm0 = vcmp.ge.f32.partialorder %v912_v0, %v1111_v26  ;;  %vm173_vm1 = vcmp.lt.f32.partialorder %v912_v0, %v1078_v41  ;;  %v261_v38 = vsub.f32 %v912_v0, %v1111_v26  ;;  %v1132_v41 = vld [vmem:[#allocation2 + $0x20] sm:$0xff] }
  0x4b   :  { %623 = vmatpush.msra.mxu0 %v608_v29  ;;  %751 = vmatpush.msra.mxu2 %v608_v29  ;;  %v388_v42 = vadd.f32 %v368_v11, %v328_v30  ;;  %775 = vpow2.f32 %v67_v34  ;;  %vm195_vm2 = vmand %vm151_vm0, %vm173_vm1  ;;  %v347_v43 = vsub.f32 1.0, %v307_v5  ;;  %v466_v45 = vsub.f32 1.0, %v1093_v8  ;;  %v281_v11 = vld [vmem:[#allocation5 + $0x18] sm:$0xff] }
  0x4c   :  { %752 = vmatpush.msra.mxu3 %v608_v29  ;;  %v559_v33 = vmul.f32 %v1102_v21, %v504_v36  ;;  %v1128_v46 = vsel %vm195_vm2, 1.0, %v865_v9  ;;  %v1130_v47 = vmul.f32 %v283_v35, %v261_v38  ;;  %v1135_v49 = vmul.f32 %v522_v37, %v262_v18  ;;  %v519_v35 = vld [vmem:[#allocation5 + $0x178] sm:$0xff] }
  0x4d   :  { %v449_v48 = vmul.f32 %v1114_v28, %v388_v42  ;;  %v590_v51 = vmul.f32 %v574_v60, %v505_v50  ;;  %v367_v44 = vmul.f32 %v718_v4, %v347_v43  ;;  %v1139_v54 = vmul.f32 %v408_v3, %v261_v38  ;;  %v1167_v50 = vld [vmem:[#allocation2 + $0x18] sm:$0xff]  ;;  %v406_v60 = vld [vmem:[#allocation5 + $0xc8] sm:$0xff] }
  0x4e   :  { %v607_v52 = vadd.f32 %v591_v39, %v559_v33  ;;  %v327_v53 = vmul.f32 %v1128_v46, %v1130_v47  ;;  %v63_v55 = vsub.f32 0.0, %v953_v40  ;;  %v484_v57 = vmul.f32 %v466_v45, %v389_v31  ;;  %v520_v31 = vld [vmem:[#allocation5 + $0x180] sm:$0xff] }
  0x4f   :  { %v1142_v56 = vadd.f32 %v485_v32, %v449_v48  ;;  %vm150_vm3 = vcmp.ge.f32.partialorder %v953_v40, %v1132_v41  ;;  %vm172_vm4 = vcmp.lt.f32.partialorder %v953_v40, %v1089_v1  ;;  %v573_v63 = vsub.f32 1.0, %v1102_v21 }
  0x50   :  { %624 = vmatpush.msra.mxu0 %v607_v52  ;;  %753 = vmatpush.msra.mxu2 %v607_v52  ;;  %v1148_v59 = vadd.f32 %v367_v44, %v327_v53  ;;  %v65_v2 = vmul.f32 1.442695, %v63_v55  ;;  %vm194_vm5 = vmand %vm150_vm3, %vm172_vm4  ;;  %v260_v4 = vsub.f32 %v953_v40, %v1132_v41  ;;  %v346_v6 = vsub.f32 1.0, %v1108_v23 }
  0x51   :  { %v776_v5 = vpop.eup %775  ;;  %754 = vmatpush.msra.mxu3 %v607_v52  ;;  %v558_v62 = vmul.f32 %v1135_v49, %v1142_v56  ;;  %v1156_v1 = vsel %vm194_vm5, 1.0, %v865_v9  ;;  %v465_v8 = vsub.f32 1.0, %v1114_v28  ;;  %v539_v14 = vmul.f32 %v521_v61, %v261_v38  ;;  %v280_v61 = vld [vmem:[#allocation5 + $0x10] sm:$0xff] }
  0x52   :  { %v1160_v12 = vadd.f32 1.0, %v776_v5  ;;  %v448_v17 = vmul.f32 %v1139_v54, %v1148_v59  ;;  %777 = vpow2.f32 %v65_v2  ;;  %v1164_v24 = vmul.f32 %v282_v58, %v260_v4 }
  0x53   :  { %v606_v10 = vadd.f32 %v590_v51, %v558_v62  ;;  %v366_v15 = vmul.f32 %v1105_v22, %v346_v6  ;;  %v589_v19 = vmul.f32 %v573_v63, %v504_v36  ;;  %v1171_v20 = vmul.f32 %v407_v7, %v260_v4  ;;  %v405_v62 = vld [vmem:[#allocation5 + $0xc0] sm:$0xff] }
  0x54   :  { %779 = vrcp.f32 %v1160_v12  ;;  %v96_v18 = vand.u32 2147483648, %v1160_v12  ;;  %v94_v21 = vand.u32 2147483647, %v1160_v12  ;;  %v502_v16 = vadd.f32 %v484_v57, %v448_v17  ;;  %v101_v36 = vld [vmem:[#allocation2] sm:$0xff] }
  0x55   :  { %625 = vmatpush.msra.mxu0 %v606_v10  ;;  %755 = vmatpush.msra.mxu2 %v606_v10  ;;  %v326_v13 = vmul.f32 %v1156_v1, %v1164_v24  ;;  %v483_v23 = vmul.f32 %v465_v8, %v388_v42  ;;  %vm90_vm6 = vweird.f32 %v1160_v12  ;;  %v572_v22 = vsub.f32 1.0, %v1135_v49  ;;  %v1209_v49 = vld [vmem:[#allocation2 + $0x10] sm:$0xff] }
  0x56   :  { %756 = vmatpush.msra.mxu3 %v606_v10  ;;  %vm149_vm7 = vcmp.ge.f32.partialorder %v912_v0, %v1167_v50  ;;  %vm171_vm8 = vcmp.lt.f32.partialorder %v912_v0, %v1111_v26  ;;  %v557_v25 = vmul.f32 %v539_v14, %v502_v16  ;;  %v1184_v39 = vmul.f32 %v520_v31, %v260_v4  ;;  %v518_v10 = vld [vmem:[#allocation5 + $0x170] sm:$0xff] }
  0x57   :  { %v1182_v27 = vadd.f32 %v366_v15, %v326_v13  ;;  %vm193_vm9 = vmand %vm149_vm7, %vm171_vm8  ;;  %v259_v28 = vsub.f32 %v912_v0, %v1167_v50  ;;  %v1188_v30 = vor.u32 1.1754944e-38, %v96_v18  ;;  %v345_v34 = vsub.f32 1.0, %v1130_v47 }
  0x58   :  { %v778_v29 = vpop.eup %777  ;;  %v1191_v32 = vsel %vm193_vm9, 1.0, %v865_v9  ;;  %v464_v26 = vsub.f32 1.0, %v1139_v54  ;;  %vm1195_vm10 = vcmp.eq.f32.partialorder %v94_v21, 8.507059e+37  ;;  %v605_v37 = vadd.f32 %v589_v19, %v557_v25  ;;  %v102_v19 = vld [vmem:[#allocation2 + $0x8] sm:$0xff] }
  0x59   :  { %v1199_v38 = vadd.f32 1.0, %v778_v29  ;;  %v447_v42 = vmul.f32 %v1171_v20, %v1182_v27  ;;  %v1203_v43 = vmul.f32 %v281_v11, %v259_v28  ;;  %v588_v45 = vmul.f32 %v572_v22, %v1142_v56  ;;  %v404_v29 = vld [vmem:[#allocation5 + $0xb8] sm:$0xff] }
  0x5a   :  { %v780_v3 = vpop.eup %779  ;;  %v365_v33 = vmul.f32 %v1128_v46, %v345_v34  ;;  %v1207_v47 = vmul.f32 %v406_v60, %v259_v28  ;;  %v571_v48 = vsub.f32 1.0, %v539_v14  ;;  %626 = vmatpush.msra.mxu0 %v605_v37  ;;  %757 = vmatpush.msra.mxu2 %v605_v37  ;;  %v482_v44 = vmul.f32 %v464_v26, %v1148_v59 }
  0x5b   :  { %v86_v51 = vmul.f32 %v780_v3, %v1160_v12  ;;  %781 = vrcp.f32 %v1199_v38  ;;  %v1214_v52 = vmul.f32 %v519_v35, %v259_v28  ;;  %vm91_vm11 = vweird.f32 %v780_v3  ;;  %758 = vmatpush.msra.mxu3 %v605_v37 }
  0x5c   :  { %v82_v53 = vand.u32 2147483648, %v1199_v38  ;;  %v501_v46 = vadd.f32 %v483_v23, %v447_v42  ;;  %v325_v54 = vmul.f32 %v1191_v32, %v1203_v43  ;;  %vm76_vm12 = vweird.f32 %v1199_v38  ;;  %vm1236_vm0 = vmor %vm90_vm6, %vm91_vm11 }
  0x5d   :  { %v87_v55 = vsub.f32 1.0, %v86_v51  ;;  %vm148_vm13 = vcmp.ge.f32.partialorder %v953_v40, %v1209_v49  ;;  %vm170_vm14 = vcmp.lt.f32.partialorder %v953_v40, %v1132_v41  ;;  %v80_v56 = vand.u32 2147483647, %v1199_v38 }
  0x5e   :  { %v556_v57 = vmul.f32 %v1184_v39, %v501_v46  ;;  %v1226_v58 = vadd.f32 %v365_v33, %v325_v54  ;;  %v587_v59 = vmul.f32 %v571_v48, %v502_v16  ;;  %vm192_vm15 = vmand %vm148_vm13, %vm170_vm14  ;;  %v1228_v2 = vor.u32 1.1754944e-38, %v82_v53  ;;  %v278_v53 = vld [vmem:[#allocation5] sm:$0xff] }
  0x5f   :  { %v88_v63 = vmul.f32 %v780_v3, %v87_v55  ;;  %v258_v4 = vsub.f32 %v953_v40, %v1209_v49  ;;  %v344_v5 = vsub.f32 1.0, %v1164_v24  ;;  %v1243_v8 = vsel %vm192_vm15, 1.0, %v865_v9 }
  0x60   :  { %v604_v6 = vadd.f32 %v588_v45, %v556_v57  ;;  %v446_v7 = vmul.f32 %v1207_v47, %v1226_v58  ;;  %v463_v17 = vsub.f32 1.0, %v1171_v20  ;;  %v570_v18 = vsub.f32 1.0, %v1184_v39  ;;  %v279_v39 = vld [vmem:[#allocation5 + $0x8] sm:$0xff] }
  0x61   :  { %v782_v14 = vpop.eup %781  ;;  %v89_v24 = vadd.f32 %v780_v3, %v88_v63  ;;  %v1246_v15 = vmul.f32 %v280_v61, %v258_v4  ;;  %v364_v12 = vmul.f32 %v1156_v1, %v344_v5  ;;  %v1253_v16 = vmul.f32 %v405_v62, %v258_v4 }
  0x62   :  { %v72_v31 = vmul.f32 %v782_v14, %v1199_v38  ;;  %vm77_vm1 = vweird.f32 %v782_v14  ;;  %627 = vmatpush.msra.mxu0 %v604_v6  ;;  %759 = vmatpush.msra.mxu2 %v604_v6  ;;  %v1251_v21 = vadd.f32 %v482_v44, %v446_v7  ;;  %v481_v1 = vmul.f32 %v463_v17, %v1182_v27  ;;  %v517_v44 = vld [vmem:[#allocation5 + $0x168] sm:$0xff] }
  0x63   :  { %v93_v20 = vsel %vm1236_vm0, %v780_v3, %v89_v24  ;;  %760 = vmatpush.msra.mxu3 %v604_v6  ;;  %v324_v13 = vmul.f32 %v1243_v8, %v1246_v15  ;;  %v1260_v23 = vmul.f32 %v518_v10, %v258_v4  ;;  %vm645_vm2 = vcmask 130048   ;;  %vm1277_vm6 = vmor %vm76_vm12, %vm77_vm1  ;;  %v516_v10 = vld [vmem:[#allocation5 + $0x160] sm:$0xff] }
  0x64   :  { %v98_v22 = vsel %vm1195_vm10, %v1188_v30, %v93_v20  ;;  %v73_v11 = vsub.f32 1.0, %v72_v31  ;;  %v555_v25 = vmul.f32 %v1214_v52, %v1251_v21  ;;  %vm147_vm3 = vcmp.ge.f32.partialorder %v912_v0, %v102_v19 }
  0x65   :  { %v100_v28 = vmul.f32 %v98_v22, %v912_v0  ;;  %v384_v60 = vadd.f32 %v364_v12, %v324_v13  ;;  %vm169_vm4 = vcmp.lt.f32.partialorder %v912_v0, %v1167_v50  ;;  %v257_v27 = vsub.f32 %v912_v0, %v102_v19  ;;  %v54_v19 = vld [vmem:[%s1344_s3 + $0x8] sm:$0xff]  ;;  %v57_v13 = vld [vmem:[%s1345_s4] sm:$0xff]  ;;  %v55_v22 = vld [vmem:[%s1344_s3 + $0x10] sm:$0xff] }
  0x66   :  { %v74_v34 = vmul.f32 %v782_v14, %v73_v11  ;;  %v603_v26 = vadd.f32 %v587_v59, %v555_v25  ;;  %vm191_vm5 = vmand %vm147_vm3, %vm169_vm4  ;;  %v343_v30 = vsub.f32 1.0, %v1203_v43  ;;  %v462_v35 = vsub.f32 1.0, %v1207_v47  ;;  %v403_v59 = vld [vmem:[#allocation5 + $0xb0] sm:$0xff]  ;;  %v60_v11 = vld [vmem:[%s1345_s4 + $0x18] sm:$0xff] }
  0x67   :  { %672 = vmatpush.msra.mxu1 %v100_v28  ;;  %v445_v50 = vmul.f32 %v1253_v16, %v384_v60  ;;  %v586_v0 = vmul.f32 %v570_v18, %v501_v46  ;;  %v712_v42 = vsel %vm191_vm5, 1.0, %v865_v9  ;;  %v301_v3 = vmul.f32 %v279_v39, %v257_v27  ;;  %v56_v25 = vld [vmem:[%s1344_s3 + $0x18] sm:$0xff] }
  0x68   :  { %v75_v45 = vadd.f32 %v782_v14, %v74_v34  ;;  %vm1283_vm7 = vcmp.eq.f32.partialorder %v80_v56, 8.507059e+37  ;;  %628 = vmatpush.msra.mxu0 %v603_v26  ;;  %761 = vmatpush.msra.mxu2 %v603_v26  ;;  %v363_v33 = vmul.f32 %v1191_v32, %v343_v30  ;;  %v424_v38 = vmul.f32 %v404_v29, %v257_v27 }
  0x69   :  { %762 = vmatpush.msra.mxu3 %v603_v26  ;;  %v499_v47 = vadd.f32 %v481_v1, %v445_v50  ;;  %v323_v48 = vmul.f32 %v712_v42, %v301_v3  ;;  %v480_v51 = vmul.f32 %v462_v35, %v1226_v58  ;;  %vm146_vm8 = vcmp.ge.f32.partialorder %v953_v40, %v101_v36  ;;  %v58_v1 = vld [vmem:[%s1345_s4 + $0x8] sm:$0xff] }
  0x6a   :  { %v79_v46 = vsel %vm1277_vm6, %v782_v14, %v75_v45  ;;  %v569_v54 = vsub.f32 1.0, %v1214_v52  ;;  %vm168_vm9 = vcmp.lt.f32.partialorder %v953_v40, %v1209_v49  ;;  %v256_v32 = vsub.f32 %v953_v40, %v101_v36  ;;  %v53_v52 = vld [vmem:[%s1344_s3] sm:$0xff]  ;;  %s697_s3 = sshll.u32 %s1346_s5, 4  ;;  %s698_s3 = int_to_ptr.hbm [resolvable:$true] %s697_s3 }
  0x6b   :  { %v84_v55 = vsel %vm1283_vm7, %v1228_v2, %v79_v46  ;;  %v554_v56 = vmul.f32 %v1260_v23, %v499_v47  ;;  %v383_v57 = vadd.f32 %v363_v33, %v323_v48  ;;  %vm190_vm10 = vmand %vm146_vm8, %vm168_vm9  ;;  %v342_v58 = vsub.f32 1.0, %v1246_v15 }
  0x6c   :  { %v99_v61 = vmul.f32 %v84_v55, %v953_v40  ;;  %v535_v49 = vmul.f32 %v517_v44, %v257_v27  ;;  %v711_v63 = vsel %vm190_vm10, 1.0, %v865_v9  ;;  %v300_v4 = vmul.f32 %v278_v53, %v256_v32 }
  0x6d   :  { %v602_v5 = vadd.f32 %v586_v0, %v554_v56  ;;  %v444_v62 = vmul.f32 %v424_v38, %v383_v57  ;;  %v362_v2 = vmul.f32 %v1243_v8, %v342_v58  ;;  %v461_v41 = vsub.f32 1.0, %v1253_v16 }
  0x6e   :  { %673 = vmatpush.msra.mxu1 %v99_v61  ;;  %v322_v6 = vmul.f32 %v711_v63, %v300_v4  ;;  %v423_v7 = vmul.f32 %v403_v59, %v256_v32  ;;  %v585_v17 = vmul.f32 %v569_v54, %v1251_v21  ;;  %v568_v24 = vsub.f32 1.0, %v1260_v23  ;;  %v59_v23 = vld [vmem:[%s1345_s4 + $0x10] sm:$0xff]  ;;  %s866_s4 = smov [#allocation7]  }
  0x6f   :  { %733 = vmatmul.msk.f32.vlgmr.msra.gmra.mxu1 %vm645_vm2, %v53_v52  ;;  %629 = vmatpush.msra.mxu0 %v602_v5  ;;  %v498_v40 = vadd.f32 %v480_v51, %v444_v62  ;;  %v479_v14 = vmul.f32 %v461_v41, %v384_v60  ;;  %v534_v12 = vmul.f32 %v516_v10, %v256_v32  ;;  %s695_s22 = sshll.u32 %s866_s4, 4  ;;  %s696_s22 = int_to_ptr.vmem [resolvable:$true] %s695_s22 }
  0x70   :  { %763 = vmatpush.msra.mxu2 %v602_v5  ;;  %764 = vmatpush.msra.mxu3 %v602_v5  ;;  %v382_v9 = vadd.f32 %v362_v2, %v322_v6  ;;  %v584_v16 = vmul.f32 %v568_v24, %v499_v47 }
  0x71   :  { %v553_v15 = vmul.f32 %v535_v49, %v498_v40 }
  0x72   :  { %v443_v8 = vmul.f32 %v423_v7, %v382_v9 }
  0x73   :  { %v601_v18 = vadd.f32 %v585_v17, %v553_v15 }
  0x74   :  { %v497_v31 = vadd.f32 %v479_v14, %v443_v8 }
  0x75   :  { %630 = vmatpush.msra.mxu0 %v601_v18  ;;  %765 = vmatpush.msra.mxu2 %v601_v18 }
  0x76   :  { %766 = vmatpush.msra.mxu3 %v601_v18  ;;  %v552_v21 = vmul.f32 %v534_v12, %v497_v31 }
  0x77   :  { %734 = vmatmul.msk.f32.gmra.mxu1 %vm645_vm2, %v54_v19 }
  0x78   :  { %v600_v20 = vadd.f32 %v584_v16, %v552_v21 }
  0x7a   :  { %631 = vmatpush.msra.mxu0 %v600_v20  ;;  %767 = vmatpush.msra.mxu2 %v600_v20 }
  0x7b   :  { %768 = vmatpush.msra.mxu3 %v600_v20  ;;  %632 = vmatmul.f32.vlgmr.msra.gmra.mxu0 %v57_v13 }
  0x7c   :  { %635 = vmatmul.f32.vlgmr.msra.gmra.mxu2 %v58_v1  ;;  %638 = vmatmul.f32.vlgmr.msra.gmra.mxu3 %v59_v23 }
  0x7f   :  { %735 = vmatmul.msk.f32.gmra.mxu1 %vm645_vm2, %v55_v22 }
  0x84   :  { %641 = vmatmul.f32.gmra.mxu3 %v60_v11 }
  0x87   :  { %736 = vmatmul.msk.f32.gmra.mxu1 %vm645_vm2, %v56_v25 }
  0xec   :  { %v675_v39 = vpop.f32.mrf.mxu1 }
  0xf4   :  { %v678_v28 = vpop.f32.mrf.mxu1 }
  0xf8   :  { %v633_v60 = vpop.f32.mrf.mxu0 }
  0xf9   :  { %v676_v27 = vadd.f32 %v675_v39, %v633_v60 }
  0xfb   :  { %687 = vst [vmem:[#allocation7] sm:$0xff] %v676_v27 }
  0xfc   :  { %v681_v29 = vpop.f32.mrf.mxu1 }
  0xff   :  { %v636_v34 = vpop.f32.mrf.mxu2  ;;  %v639_v26 = vpop.f32.mrf.mxu3 }
 0x100   :  { %v679_v30 = vadd.f32 %v678_v28, %v636_v34  ;;  %v682_v35 = vadd.f32 %v681_v29, %v639_v26 }
 0x102   :  { %688 = vst [vmem:[#allocation7 + $0x8] sm:$0xff] %v679_v30 }
 0x103   :  { %689 = vst [vmem:[#allocation7 + $0x10] sm:$0xff] %v682_v35 }
 0x104   :  { %v684_v36 = vpop.f32.mrf.mxu1 }
 0x107   :  { %v642_v37 = vpop.f32.mrf.mxu3 }
 0x108   :  { %v685_v50 = vadd.f32 %v684_v36, %v642_v37 }
 0x10a   :  { %690 = vst [vmem:[#allocation7 + $0x18] sm:$0xff] %v685_v50 }
 0x10b   :  { %703 = dma.vmem_to_hbm [thread:$0]  %s696_s22, 512, %s698_s3, [#allocation4], %s862_s26, %s862_s26, %s863_s27  }
 0x10c   :  { %859 = dma.done.wait [#allocation4], 512  }
 0x10d   :  { %860 = vsyncadd [#allocation4], 4294966784 }
 0x10e   :  { %708 = vsyncpa [#allocation3], 1 }
 0x10f   :  { %709 = vsyncpa [#allocation6], 1 }
 0x110   :  { %710 = vsyncpa [#allocation4], 1 }

</bundles_post_ra>
